<compile_context>
chip_gen: v6e
topology: v6e:2x2x1
jax: 0.10.0
libtpu: 0.0.40
codegen_flags: <defaults>
</compile_context>

<pallas_src>
import jax
import jax.numpy as jnp
from jax import lax
from jax.experimental import pallas as pl
from jax.experimental.pallas import tpu as pltpu


def _round_up(x, m):
    return ((x + m - 1) // m) * m


# ----------------------------- Pallas kernel ------------------------------ #
def char_rnn_kernel(tok_ref,     # (Tc, Bt, 1) int32 token ids, time-major
                    table_ref,   # (Vp, Hp)    fused  emb@W_ih + b_ih + b_hh
                    whh_ref,     # (Hp, Hp)    hidden->hidden weight
                    wfc_ref,     # (Hp, Op)    fc weight
                    bfc_ref,     # (1, Op)     fc bias (f32)
                    out_ref,     # (Bt, Op)    logits of the last timestep
                    h_ref):      # (Bt, Hp)    persistent hidden state scratch
    t_chunk = pl.program_id(1)

    # h_0 = 0 (PyTorch default) at the start of every batch tile's T sweep.
    @pl.when(t_chunk == 0)
    def _():
        h_ref[...] = jnp.zeros_like(h_ref)

    Tc, Bt, _ = tok_ref.shape
    Vp = table_ref.shape[0]
    w_dtype = table_ref.dtype

    # Hoisted: JAX does not CSE broadcast_in_dim inside the loop.
    vocab_iota = lax.broadcasted_iota(jnp.int32, (Bt, Vp), 1)

    def step(t, h):
        ids = tok_ref[t]                                          # (Bt, 1) i32
        onehot = (ids == vocab_iota).astype(w_dtype)              # (Bt, Vp)
        # In-kernel embedding gather as an MXU matmul (exact row select).
        x_proj = jnp.dot(onehot, table_ref[...],
                         preferred_element_type=jnp.float32)      # (Bt, Hp) f32
        pre = x_proj + jnp.dot(h.astype(w_dtype), whh_ref[...],
                               preferred_element_type=jnp.float32)
        return jnp.tanh(pre)                                      # f32 tanh

    # Hidden state carried in vregs; partial unroll keeps LLO visibility
    # without exploding code size / vreg pressure for long chunks.
    h = lax.fori_loop(0, Tc, step, h_ref[...], unroll=4)
    h_ref[...] = h

    # Final fully-connected layer only on the very last time chunk.
    @pl.when(t_chunk == pl.num_programs(1) - 1)
    def _():
        out_ref[...] = (jnp.dot(h.astype(wfc_ref.dtype), wfc_ref[...],
                                preferred_element_type=jnp.float32)
                        + bfc_ref[...])


# ------------------------------ Host wrapper ------------------------------ #
def char_rnn_forward(x_tokens, params, *, param_dtype=jnp.float32,
                     t_chunk_hint=64, batch_tile_hint=128):
    """x_tokens: int32 (B, T) token ids. Returns float32 (B, O) logits."""
    emb_table = params["emb_table"]                  # (V, E)
    W_ih, W_hh = params["W_ih"], params["W_hh"]      # (E, H), (H, H)
    b_ih, b_hh = params["b_ih"], params["b_hh"]      # (H,), (H,)
    W_fc, b_fc = params["W_fc"], params["b_fc"]      # (H, O), (O,)

    B, T = x_tokens.shape
    V = emb_table.shape[0]
    H = W_hh.shape[0]
    O = W_fc.shape[1]

    # Lane/sublane-friendly padded sizes.
    Hp = _round_up(max(H, 128), 128)   # TODO(synk): 256-wide tiles on v6e/v7x
    Op = _round_up(max(O, 128), 128)
    Vp = _round_up(V, 8)
    Bp = _round_up(max(B, 8), 8)

    # Batch tile (split across TensorCores on v7x via the "parallel" axis).
    if Bp <= batch_tile_hint:
        Bt = Bp
    else:
        Bt = _round_up(batch_tile_hint, 8)
        Bp = _round_up(Bp, Bt)
    nb = Bp // Bt

    # Time chunk: largest divisor of T <= hint (no padding of T — padding
    # would add recurrence steps and change the result).
    Tc = 1
    for d in range(min(T, t_chunk_hint), 0, -1):
        if T % d == 0:
            Tc = d
            break
    nt = T // Tc

    # Fuse the non-recurrent projection and both RNN biases into one table.
    proj_table = (emb_table @ W_ih + (b_ih + b_hh)).astype(jnp.float32)  # (V, H)
    proj_table = jnp.pad(proj_table, ((0, Vp - V), (0, Hp - H)))
    proj_table = proj_table.astype(param_dtype)                          # (Vp, Hp)

    W_hh_p = jnp.pad(W_hh, ((0, Hp - H), (0, Hp - H))).astype(param_dtype)
    W_fc_p = jnp.pad(W_fc, ((0, Hp - H), (0, Op - O))).astype(param_dtype)
    b_fc_p = jnp.pad(b_fc, (0, Op - O)).reshape(1, Op).astype(jnp.float32)

    # Time-major tokens (T, Bp, 1); padded batch rows use token 0 and are
    # sliced away below. This is the ONLY per-timestep HBM traffic.
    tok = jnp.pad(x_tokens, ((0, Bp - B), (0, 0))).astype(jnp.int32)
    tok_tm = tok.T.reshape(T, Bp, 1)

    # VMEM budget derived from tile sizes (conservative x2 double buffering),
    # clamped to [32 MiB, 48 MiB] so it is >= defaults and fits v7x's 64 MiB.
    itemsize = jnp.dtype(param_dtype).itemsize
    vmem_needed = (2 * Tc * Bt * 4
                   + 2 * (Vp * Hp + Hp * Hp + Hp * Op) * itemsize
                   + 2 * Op * 4
                   + 2 * Bt * Op * 4
                   + Bt * Hp * 4)
    vmem_limit = int(min(48 << 20, max(32 << 20, 2 * vmem_needed)))

    out = pl.pallas_call(
        char_rnn_kernel,
        out_shape=jax.ShapeDtypeStruct((Bp, Op), jnp.float32),
        grid=(nb, nt),
        in_specs=[
            pl.BlockSpec((Tc, Bt, 1), lambda b, t: (t, b, 0)),   # token chunk
            pl.BlockSpec((Vp, Hp), lambda b, t: (0, 0)),         # resident
            pl.BlockSpec((Hp, Hp), lambda b, t: (0, 0)),         # resident
            pl.BlockSpec((Hp, Op), lambda b, t: (0, 0)),         # resident
            pl.BlockSpec((1, Op), lambda b, t: (0, 0)),          # resident
        ],
        out_specs=pl.BlockSpec((Bt, Op), lambda b, t: (b, 0)),
        scratch_shapes=[pltpu.VMEM((Bt, Hp), jnp.float32)],      # persistent h
        compiler_params=pltpu.CompilerParams(
            dimension_semantics=("parallel", "arbitrary"),
            vmem_limit_bytes=vmem_limit),
    )(tok_tm, proj_table, W_hh_p, W_fc_p, b_fc_p)

    return out[:B, :O]


# ------------------------- Pure-JAX reference ------------------------------ #
def char_rnn_reference(x_tokens, params):
    emb = jnp.take(params["emb_table"], x_tokens, axis=0)  # (B, T, E)
    B, T, _ = emb.shape
    H = params["W_hh"].shape[0]
    h = jnp.zeros((B, H), jnp.float32)
    for t in range(T):
        h = jnp.tanh(emb[:, t, :] @ params["W_ih"] + h @ params["W_hh"]
                     + params["b_ih"] + params["b_hh"])
    return h @ params["W_fc"] + params["b_fc"]


# ---------------------------------- Main ----------------------------------- #
if __name__ == "__main__":
    # Small, deterministic configuration consistent with the module:
    # vocab (input_size = output_size) = 32, embedding_dim = 32,
    # hidden_size = 32, num_hidden_layers = 1, batch = 2, seq = 8.
    V, E, H, O = 32, 32, 32, 32
    B, T = 2, 8

    key = jax.random.PRNGKey(0)
    ks = jax.random.split(key, 8)
    scale = 0.1
    params = {
        "emb_table": scale * jax.random.normal(ks[0], (V, E), jnp.float32),
        # PyTorch stores weight_ih_l0 as (H, E); we pass the transpose (E, H).
        "W_ih": scale * jax.random.normal(ks[1], (E, H), jnp.float32),
        "W_hh": scale * jax.random.normal(ks[2], (H, H), jnp.float32),
        "b_ih": scale * jax.random.normal(ks[3], (H,), jnp.float32),
        "b_hh": scale * jax.random.normal(ks[4], (H,), jnp.float32),
        # PyTorch fc.weight is (O, H); we pass the transpose (H, O).
        "W_fc": scale * jax.random.normal(ks[5], (H, O), jnp.float32),
        "b_fc": scale * jax.random.normal(ks[6], (O,), jnp.float32),
    }

    x_tokens = jax.random.randint(ks[7], (B, T), 0, V, dtype=jnp.int32)

    ref = char_rnn_reference(x_tokens, params)

    # f32 path; t_chunk_hint=4 -> 2 time chunks, exercising the persistent
    # hidden-state scratch across the "arbitrary" grid axis.
    out = char_rnn_forward(x_tokens, params, t_chunk_hint=4)
    out = jax.block_until_ready(out)
    assert out.shape == (B, O)
    assert jnp.allclose(out, ref, rtol=1e-4, atol=1e-5), "f32 mismatch vs reference"

    # bf16 weights/projection path (full-rate MXU on v6e/v7x), f32 accum/tanh.
    out_bf16 = char_rnn_forward(x_tokens, params, param_dtype=jnp.bfloat16,
                                t_chunk_hint=4)
    out_bf16 = jax.block_until_ready(out_bf16)
    assert jnp.allclose(out_bf16, ref, rtol=5e-2, atol=5e-2), "bf16 mismatch vs reference"

    print("KERNEL_OK")
</pallas_src>

<mosaic_0001>
module attributes {stable_mosaic.version = 11 : i64} {
  func.func @char_rnn_kernel(%arg0: i32, %arg1: i32, %arg2: memref<4x8x1xi32, #tpu.memory_space<vmem>>, %arg3: memref<32x128xf32, #tpu.memory_space<vmem>>, %arg4: memref<128x128xf32, #tpu.memory_space<vmem>>, %arg5: memref<128x128xf32, #tpu.memory_space<vmem>>, %arg6: memref<1x128xf32, #tpu.memory_space<vmem>>, %arg7: memref<8x128xf32, #tpu.memory_space<vmem>>, %arg8: memref<8x128xf32, #tpu.memory_space<vmem>>) attributes {dimension_semantics = [#tpu.dimension_semantics<parallel>, #tpu.dimension_semantics<arbitrary>], iteration_bounds = array<i64: 1, 2>, scalar_prefetch = 0 : i64, scratch_operands = 1 : i64, tpu.core_type = #tpu.core_type<tc>, window_params = [{transform_indices = @transform_0, window_bounds = array<i64: 4, 8, 1>}, {pipeline_mode = #tpu.pipeline_mode<synchronous>, transform_indices = @transform_1, window_bounds = array<i64: 32, 128>}, {pipeline_mode = #tpu.pipeline_mode<synchronous>, transform_indices = @transform_2, window_bounds = array<i64: 128, 128>}, {pipeline_mode = #tpu.pipeline_mode<synchronous>, transform_indices = @transform_3, window_bounds = array<i64: 128, 128>}, {pipeline_mode = #tpu.pipeline_mode<synchronous>, transform_indices = @transform_4, window_bounds = array<i64: 1, 128>}, {transform_indices = @transform_5, window_bounds = array<i64: 8, 128>}]} {
    %c0_i32 = arith.constant 0 : i32
    %0 = arith.cmpi eq, %arg1, %c0_i32 : i32
    %1 = arith.extui %0 : i1 to i32
    %c0_i32_0 = arith.constant 0 : i32
    %2 = arith.cmpi ne, %1, %c0_i32_0 : i32
    scf.if %2 {
      %cst_38 = arith.constant 0.000000e+00 : f32
      %61 = vector.broadcast %cst_38 : f32 to vector<8x128xf32>
      %c0_39 = arith.constant 0 : index
      %c0_40 = arith.constant 0 : index
      %62 = vector.load %arg8[%c0_39, %c0_40] : memref<8x128xf32, #tpu.memory_space<vmem>>, vector<8x128xf32>
      tpu.vector_store %arg8[%c0_39, %c0_40], %61 {strides = array<i32>} : memref<8x128xf32, #tpu.memory_space<vmem>>, vector<8x128xf32>,
    } else {
    }
    %3 = tpu.iota {dimensions = array<i32: 1>} : vector<8x32xi32>
    %c0 = arith.constant 0 : index
    %c0_1 = arith.constant 0 : index
    %4 = vector.load %arg8[%c0, %c0_1] : memref<8x128xf32, #tpu.memory_space<vmem>>, vector<8x128xf32>
    %c0_i32_2 = arith.constant 0 : i32
    %5 = arith.index_cast %c0_i32_2 : i32 to index
    %c0_3 = arith.constant 0 : index
    %c0_4 = arith.constant 0 : index
    %6 = vector.load %arg2[%5, %c0_3, %c0_4] : memref<4x8x1xi32, #tpu.memory_space<vmem>>, vector<1x8x1xi32>
    %7 = vector.shape_cast %6 : vector<1x8x1xi32> to vector<8x1xi32>
    %8 = vector.broadcast %7 : vector<8x1xi32> to vector<8x32xi32>
    %9 = arith.cmpi eq, %8, %3 : vector<8x32xi32>
    %10 = arith.extui %9 : vector<8x32xi1> to vector<8x32xi32>
    %11 = arith.sitofp %10 : vector<8x32xi32> to vector<8x32xf32>
    %c0_5 = arith.constant 0 : index
    %c0_6 = arith.constant 0 : index
    %12 = vector.load %arg3[%c0_5, %c0_6] : memref<32x128xf32, #tpu.memory_space<vmem>>, vector<32x128xf32>
    %cst = arith.constant dense<0.000000e+00> : vector<8x128xf32>
    %13 = tpu.matmul %11, %12, %cst {dimension_numbers = #tpu.dot_dimension_numbers<[1], [0], [0], [1], [0, 0, 1, 1], [], []>} : vector<8x32xf32>, vector<32x128xf32>, vector<8x128xf32> -> vector<8x128xf32>
    %c0_7 = arith.constant 0 : index
    %c0_8 = arith.constant 0 : index
    %14 = vector.load %arg4[%c0_7, %c0_8] : memref<128x128xf32, #tpu.memory_space<vmem>>, vector<128x128xf32>
    %cst_9 = arith.constant dense<0.000000e+00> : vector<8x128xf32>
    %15 = tpu.matmul %4, %14, %cst_9 {dimension_numbers = #tpu.dot_dimension_numbers<[1], [0], [0], [1], [0, 0, 1, 1], [], []>} : vector<8x128xf32>, vector<128x128xf32>, vector<8x128xf32> -> vector<8x128xf32>
    %16 = arith.addf %13, %15 : vector<8x128xf32>
    %17 = math.tanh %16 : vector<8x128xf32>
    %c1_i32 = arith.constant 1 : i32
    %18 = arith.index_cast %c1_i32 : i32 to index
    %c0_10 = arith.constant 0 : index
    %c0_11 = arith.constant 0 : index
    %19 = vector.load %arg2[%18, %c0_10, %c0_11] : memref<4x8x1xi32, #tpu.memory_space<vmem>>, vector<1x8x1xi32>
    %20 = vector.shape_cast %19 : vector<1x8x1xi32> to vector<8x1xi32>
    %21 = vector.broadcast %20 : vector<8x1xi32> to vector<8x32xi32>
    %22 = arith.cmpi eq, %21, %3 : vector<8x32xi32>
    %23 = arith.extui %22 : vector<8x32xi1> to vector<8x32xi32>
    %24 = arith.sitofp %23 : vector<8x32xi32> to vector<8x32xf32>
    %c0_12 = arith.constant 0 : index
    %c0_13 = arith.constant 0 : index
    %25 = vector.load %arg3[%c0_12, %c0_13] : memref<32x128xf32, #tpu.memory_space<vmem>>, vector<32x128xf32>
    %cst_14 = arith.constant dense<0.000000e+00> : vector<8x128xf32>
    %26 = tpu.matmul %24, %25, %cst_14 {dimension_numbers = #tpu.dot_dimension_numbers<[1], [0], [0], [1], [0, 0, 1, 1], [], []>} : vector<8x32xf32>, vector<32x128xf32>, vector<8x128xf32> -> vector<8x128xf32>
    %c0_15 = arith.constant 0 : index
    %c0_16 = arith.constant 0 : index
    %27 = vector.load %arg4[%c0_15, %c0_16] : memref<128x128xf32, #tpu.memory_space<vmem>>, vector<128x128xf32>
    %cst_17 = arith.constant dense<0.000000e+00> : vector<8x128xf32>
    %28 = tpu.matmul %17, %27, %cst_17 {dimension_numbers = #tpu.dot_dimension_numbers<[1], [0], [0], [1], [0, 0, 1, 1], [], []>} : vector<8x128xf32>, vector<128x128xf32>, vector<8x128xf32> -> vector<8x128xf32>
    %29 = arith.addf %26, %28 : vector<8x128xf32>
    %30 = math.tanh %29 : vector<8x128xf32>
    %c2_i32 = arith.constant 2 : i32
    %31 = arith.index_cast %c2_i32 : i32 to index
    %c0_18 = arith.constant 0 : index
    %c0_19 = arith.constant 0 : index
    %32 = vector.load %arg2[%31, %c0_18, %c0_19] : memref<4x8x1xi32, #tpu.memory_space<vmem>>, vector<1x8x1xi32>
    %33 = vector.shape_cast %32 : vector<1x8x1xi32> to vector<8x1xi32>
    %34 = vector.broadcast %33 : vector<8x1xi32> to vector<8x32xi32>
    %35 = arith.cmpi eq, %34, %3 : vector<8x32xi32>
    %36 = arith.extui %35 : vector<8x32xi1> to vector<8x32xi32>
    %37 = arith.sitofp %36 : vector<8x32xi32> to vector<8x32xf32>
    %c0_20 = arith.constant 0 : index
    %c0_21 = arith.constant 0 : index
    %38 = vector.load %arg3[%c0_20, %c0_21] : memref<32x128xf32, #tpu.memory_space<vmem>>, vector<32x128xf32>
    %cst_22 = arith.constant dense<0.000000e+00> : vector<8x128xf32>
    %39 = tpu.matmul %37, %38, %cst_22 {dimension_numbers = #tpu.dot_dimension_numbers<[1], [0], [0], [1], [0, 0, 1, 1], [], []>} : vector<8x32xf32>, vector<32x128xf32>, vector<8x128xf32> -> vector<8x128xf32>
    %c0_23 = arith.constant 0 : index
    %c0_24 = arith.constant 0 : index
    %40 = vector.load %arg4[%c0_23, %c0_24] : memref<128x128xf32, #tpu.memory_space<vmem>>, vector<128x128xf32>
    %cst_25 = arith.constant dense<0.000000e+00> : vector<8x128xf32>
    %41 = tpu.matmul %30, %40, %cst_25 {dimension_numbers = #tpu.dot_dimension_numbers<[1], [0], [0], [1], [0, 0, 1, 1], [], []>} : vector<8x128xf32>, vector<128x128xf32>, vector<8x128xf32> -> vector<8x128xf32>
    %42 = arith.addf %39, %41 : vector<8x128xf32>
    %43 = math.tanh %42 : vector<8x128xf32>
    %c3_i32 = arith.constant 3 : i32
    %44 = arith.index_cast %c3_i32 : i32 to index
    %c0_26 = arith.constant 0 : index
    %c0_27 = arith.constant 0 : index
    %45 = vector.load %arg2[%44, %c0_26, %c0_27] : memref<4x8x1xi32, #tpu.memory_space<vmem>>, vector<1x8x1xi32>
    %46 = vector.shape_cast %45 : vector<1x8x1xi32> to vector<8x1xi32>
    %47 = vector.broadcast %46 : vector<8x1xi32> to vector<8x32xi32>
    %48 = arith.cmpi eq, %47, %3 : vector<8x32xi32>
    %49 = arith.extui %48 : vector<8x32xi1> to vector<8x32xi32>
    %50 = arith.sitofp %49 : vector<8x32xi32> to vector<8x32xf32>
    %c0_28 = arith.constant 0 : index
    %c0_29 = arith.constant 0 : index
    %51 = vector.load %arg3[%c0_28, %c0_29] : memref<32x128xf32, #tpu.memory_space<vmem>>, vector<32x128xf32>
    %cst_30 = arith.constant dense<0.000000e+00> : vector<8x128xf32>
    %52 = tpu.matmul %50, %51, %cst_30 {dimension_numbers = #tpu.dot_dimension_numbers<[1], [0], [0], [1], [0, 0, 1, 1], [], []>} : vector<8x32xf32>, vector<32x128xf32>, vector<8x128xf32> -> vector<8x128xf32>
    %c0_31 = arith.constant 0 : index
    %c0_32 = arith.constant 0 : index
    %53 = vector.load %arg4[%c0_31, %c0_32] : memref<128x128xf32, #tpu.memory_space<vmem>>, vector<128x128xf32>
    %cst_33 = arith.constant dense<0.000000e+00> : vector<8x128xf32>
    %54 = tpu.matmul %43, %53, %cst_33 {dimension_numbers = #tpu.dot_dimension_numbers<[1], [0], [0], [1], [0, 0, 1, 1], [], []>} : vector<8x128xf32>, vector<128x128xf32>, vector<8x128xf32> -> vector<8x128xf32>
    %55 = arith.addf %52, %54 : vector<8x128xf32>
    %56 = math.tanh %55 : vector<8x128xf32>
    %c4_i32 = arith.constant 4 : i32
    %c0_34 = arith.constant 0 : index
    %c0_35 = arith.constant 0 : index
    %57 = vector.load %arg8[%c0_34, %c0_35] : memref<8x128xf32, #tpu.memory_space<vmem>>, vector<8x128xf32>
    tpu.vector_store %arg8[%c0_34, %c0_35], %56 {strides = array<i32>} : memref<8x128xf32, #tpu.memory_space<vmem>>, vector<8x128xf32>,
    %c1_i32_36 = arith.constant 1 : i32
    %58 = arith.cmpi eq, %arg1, %c1_i32_36 : i32
    %59 = arith.extui %58 : i1 to i32
    %c0_i32_37 = arith.constant 0 : i32
    %60 = arith.cmpi ne, %59, %c0_i32_37 : i32
    scf.if %60 {
      %c0_38 = arith.constant 0 : index
      %c0_39 = arith.constant 0 : index
      %61 = vector.load %arg5[%c0_38, %c0_39] : memref<128x128xf32, #tpu.memory_space<vmem>>, vector<128x128xf32>
      %cst_40 = arith.constant dense<0.000000e+00> : vector<8x128xf32>
      %62 = tpu.matmul %56, %61, %cst_40 {dimension_numbers = #tpu.dot_dimension_numbers<[1], [0], [0], [1], [0, 0, 1, 1], [], []>} : vector<8x128xf32>, vector<128x128xf32>, vector<8x128xf32> -> vector<8x128xf32>
      %c0_41 = arith.constant 0 : index
      %c0_42 = arith.constant 0 : index
      %63 = vector.load %arg6[%c0_41, %c0_42] : memref<1x128xf32, #tpu.memory_space<vmem>>, vector<1x128xf32>
      %64 = vector.broadcast %63 : vector<1x128xf32> to vector<8x128xf32>
      %65 = arith.addf %62, %64 : vector<8x128xf32>
      %c0_43 = arith.constant 0 : index
      %c0_44 = arith.constant 0 : index
      %66 = vector.load %arg7[%c0_43, %c0_44] : memref<8x128xf32, #tpu.memory_space<vmem>>, vector<8x128xf32>
      tpu.vector_store %arg7[%c0_43, %c0_44], %65 {strides = array<i32>} : memref<8x128xf32, #tpu.memory_space<vmem>>, vector<8x128xf32>,
    } else {
    }
    return
  }
  func.func @transform_0(%arg0: i32, %arg1: i32) -> (i32, i32, i32) {
    %c0_i32 = arith.constant 0 : i32
    %c0_i32_0 = arith.constant 0 : i32
    return %arg1, %arg0, %c0_i32 : i32, i32, i32
  }
  func.func @transform_1(%arg0: i32, %arg1: i32) -> (i32, i32) {
    %c0_i32 = arith.constant 0 : i32
    %c0_i32_0 = arith.constant 0 : i32
    %c0_i32_1 = arith.constant 0 : i32
    return %c0_i32, %c0_i32_0 : i32, i32
  }
  func.func @transform_2(%arg0: i32, %arg1: i32) -> (i32, i32) {
    %c0_i32 = arith.constant 0 : i32
    %c0_i32_0 = arith.constant 0 : i32
    %c0_i32_1 = arith.constant 0 : i32
    return %c0_i32, %c0_i32_0 : i32, i32
  }
  func.func @transform_3(%arg0: i32, %arg1: i32) -> (i32, i32) {
    %c0_i32 = arith.constant 0 : i32
    %c0_i32_0 = arith.constant 0 : i32
    %c0_i32_1 = arith.constant 0 : i32
    return %c0_i32, %c0_i32_0 : i32, i32
  }
  func.func @transform_4(%arg0: i32, %arg1: i32) -> (i32, i32) {
    %c0_i32 = arith.constant 0 : i32
    %c0_i32_0 = arith.constant 0 : i32
    %c0_i32_1 = arith.constant 0 : i32
    return %c0_i32, %c0_i32_0 : i32, i32
  }
  func.func @transform_5(%arg0: i32, %arg1: i32) -> (i32, i32) {
    %c0_i32 = arith.constant 0 : i32
    %c0_i32_0 = arith.constant 0 : i32
    return %arg0, %c0_i32 : i32, i32
  }
}

</mosaic_0001>

<bundles_post_ra>
// kernel: tpu_custom_call.1
= control target key start
LH: loop header
LB: loop body
LE: loop exit
PB: predicated region body
PF: predicated region fallthrough
CT: control target
= control target key end

     0   :  { %10 = vsyncpa [#allocation4], 0  ;;  %s2015_s0 = inlined_call_operand.vmem [shape: s32[8,8,1], index: 0, kind: input, shape index: {}]   ;;  %s2016_s1 = inlined_call_operand.vmem [shape: f32[32,128], index: 1, kind: input, shape index: {}]   ;;  %s2017_s2 = inlined_call_operand.hbm [shape: f32[128,128], index: 2, kind: input, shape index: {}]   ;;  %s2018_s3 = inlined_call_operand.hbm [shape: f32[128,128], index: 3, kind: input, shape index: {}]   ;;  %s2019_s4 = inlined_call_operand.vmem [shape: f32[1,128], index: 4, kind: input, shape index: {}]   ;;  %s2020_s5 = inlined_call_operand.hbm [shape: f32[8,128], index: 5, kind: output, shape index: {}]  }
   0x1   :  { %11 = vsyncpa [#allocation7], 0 }
   0x2   :  { %12 = vsyncpa [#allocation5], 0  ;;  %s1665_s18 = smov 0   ;;  %s1667_s19 = smov 0  }
   0x3   :  { %s1669_s20 = smov 0  }
   0x4 LB: > { %s1090_s21 = sadd.s32 4294967295, %s1622_s20   ;;  %s27_s22 = sadd.s32 1, %s1618_s19  ;;  %s1622_s20 = sphi %s1669_s20, %s18_s20   ;;  %s1618_s19 = sphi %s1667_s19, %s2026_s19   ;;  %s1614_s18 = sphi %s1665_s18, %s2025_s18  }
   0x5   : > { %p28_p0 = scmp.ge.s32.totalorder %s27_s22, 2  ;;  %p1091_p1 = scmp.ge.s32.totalorder %s1622_s20, 1 }
   0x6   : > { %p173_p2 = scmp.lt.s32.totalorder %s1622_s20, 3  ;;  %p1692_p4 = scmp.eq.s32.totalorder %s1090_s21, 0 }
   0x7   : > { %s2028_s22 = smov (%p28_p0, %s27_s22), 0  ;;  %s1624_s25 = smov [#allocation3]  }
   0x8   : > { %p1686_p3 = pnand %p1091_p1, %p173_p2  ;;  %s188_s26 = sshll.u32 %s1624_s25, 4  ;;  %s189_s26 = int_to_ptr.vmem [resolvable:$true] %s188_s26 }
   0x9   : > { %s1625_s28 = smov [#allocation6]   ;;  %s1523_s30 = scalar_lea.vmem %s189_s26, 2048 }
   0xa   : > { %p1454_p5 = pneg %p1686_p3  ;;  %s201_s29 = sshll.u32 %s1625_s28, 4  ;;  %s202_s29 = int_to_ptr.vmem [resolvable:$true] %s201_s29 }
   0xb   : > { %p1524_p8 = scmp.ne.s32.totalorder %s189_s26, %s1523_s30  ;;  %p1531_p11 = scmp.lt.s32.totalorder %s189_s26, %s189_s26 }
   0xc   : > { %p1700_p6 = pnand %p1692_p4, %p1454_p5  ;;  %p1532_p12 = scmp.lt.s32.totalorder %s1523_s30, %s1523_s30 }
   0xe   : > { %p1514_p7 = pneg %p1700_p6  ;;  %p1533_p13 = por %p1532_p12, %p1531_p11 }
  0x10   : > { %p1526_p9 = pnand %p1524_p8, %p1514_p7 }
  0x12   : > { %p1527_p10 = pneg %p1526_p9 }
  0x14   : > { %p1534_p0 = pnand %p1533_p13, %p1527_p10 }
  0x16   : > { %1537 = shalt.err (!%p1534_p0)
}
  0x17   : > { %s1626_s6 = smov 128   ;;  %s1627_s7 = smov 8  }
  0x18   : > { %1457 = dma.hbm_to_vmem [thread:$0]  (!%p1700_p6), %s2017_s2, 2048, %s189_s26, [#allocation4], %s1626_s6, %s1626_s6, %s1627_s7  }
  0x19   : > { %s1549_s10 = scalar_lea.vmem %s202_s29, 2048  ;;  %p1557_p8 = scmp.lt.s32.totalorder %s202_s29, %s202_s29 }
  0x1a   : > { %p1550_p1 = scmp.ne.s32.totalorder %s202_s29, %s1549_s10  ;;  %p1558_p9 = scmp.lt.s32.totalorder %s1549_s10, %s1549_s10 }
  0x1c   : > { %p1552_p2 = pnand %p1550_p1, %p1514_p7  ;;  %p1559_p11 = por %p1558_p9, %p1557_p8 }
  0x1e   : > { %p1553_p5 = pneg %p1552_p2 }
  0x20   : > { %p1560_p10 = pnand %p1559_p11, %p1553_p5 }
  0x22   : > { %1563 = shalt.err (!%p1560_p10)
}
  0x23   : > { %1460 = dma.hbm_to_vmem [thread:$0]  (!%p1700_p6), %s2018_s3, 2048, %s202_s29, [#allocation7], %s1626_s6, %s1626_s6, %s1627_s7  }
  0x24   : > { %232 = sbr.rel (%p1686_p3) target bundleno = 1262 (0x4ee), region = 40 }
  0x29   : > { %1601 = dma.done.wait (%p1692_p4), [#allocation4], 2048  }
  0x2a   : > { %1603 = vsyncadd (%p1692_p4), [#allocation4], 4294965248 }
  0x2b   : > { %1605 = dma.done.wait (%p1692_p4), [#allocation7], 2048  }
  0x2c   : > { %1607 = vsyncadd (%p1692_p4), [#allocation7], 4294965248  ;;  %s1098_s13 = sshll.u32 %s1614_s18, 2  ;;  %p1100_p3 = scmp.ne.s32.totalorder %s1614_s18, 0 }
  0x2d   : > { %p263_p7 = scmp.lt.s32.totalorder %s1098_s13, 7 }
  0x2e   : > { %274 = sbr.rel (%p1100_p3) target bundleno = 53 (0x35), region = 52 }
  0x2f   : > { %s2030_s13 = smov (!%p263_p7, %s1098_s13), 7 }
  0x30   : > { %s1099_s14 = sshll.u32 %s2030_s13, 3 }
  0x31   : > { %s1736_s17 = scalar_lea.vmem %s2015_s0, %s1099_s14 }
  0x33   : > { %v1628_v0 = vmov 0.0  }
  0x34   : > { %275 = vst [vmem:[#allocation2] sm:$0xff] %v1628_v0 }
  0x35 PF: > { %v279_v1 = vld [vmem:[%s1736_s17] sm:$0xff]  ;;  %v1629_v3 = vmov 0   ;;  %v1630_v4 = vmov 0.0   ;;  %v1743_v5 = vld [vmem:[#allocation3 + $0x70] sm:$0xff]  ;;  %v1103_v6 = vld [vmem:[%s1736_s17 + $0x8] sm:$0xff]  ;;  %vm1631_vm0 = vmmov 0   ;;  %v276_v26 = vlaneseq }
  0x36   : > { %v1740_v2 = vld [vmem:[#allocation3 + $0x78] sm:$0xff]  ;;  %1502 = vset.pattern.permute.xlu0 %v1629_v3  ;;  %1223 = vmatprep.subr.mxu0 %v1630_v4  ;;  %v1748_v7 = vld [vmem:[#allocation3 + $0x68] sm:$0xff]  ;;  %v1755_v8 = vld [vmem:[#allocation3 + $0x60] sm:$0xff]  ;;  %vm376_vm1 = vcmask 261120   ;;  %p1112_p4 = scmp.ne.s32.totalorder %s1614_s18, 1 }
  0x37   : > { %281 = vperm.xlu0 %1502, %v279_v1   ;;  %1224 = vmatpush3.msra.mxu0 %v1740_v2  ;;  %v1760_v9 = vld [vmem:[%s2016_s1 + $0x18] sm:$0xff]  ;;  %v1768_v10 = vld [vmem:[%s2016_s1 + $0x10] sm:$0xff]  ;;  %v1771_v11 = vld [vmem:[#allocation3 + $0x58] sm:$0xff]  ;;  %v1849_v27 = vand.u32 127, %v276_v26 }
  0x38   : > { %1225 = vmatprep.subr.mxu0 %v1630_v4  ;;  %1258 = vmatprep.subr.mxu1 %v1630_v4  ;;  %v1779_v12 = vld [vmem:[%s2016_s1 + $0x8] sm:$0xff]  ;;  %v1782_v13 = vld [vmem:[#allocation3 + $0x50] sm:$0xff]  ;;  %v1790_v14 = vld [vmem:[%s2016_s1] sm:$0xff] }
  0x39   : > { %1226 = vmatpush3.msra.mxu0 %v1743_v5  ;;  %1255 = vmatprep.mubr.msk.f32.mxu0 %vm1631_vm0, %v1630_v4  ;;  %v1793_v15 = vld [vmem:[#allocation3 + $0x48] sm:$0xff]  ;;  %v1799_v16 = vld [vmem:[#allocation3 + $0x40] sm:$0xff]  ;;  %v1805_v17 = vld [vmem:[#allocation3 + $0x38] sm:$0xff] }
  0x3a   : > { %1227 = vmatprep.subr.mxu0 %v1630_v4  ;;  %1266 = vmatprep.mubr.msk.f32.mxu1 %vm1631_vm0, %v1630_v4  ;;  %v1809_v18 = vld [vmem:[#allocation3 + $0x30] sm:$0xff]  ;;  %v1813_v19 = vld [vmem:[#allocation3 + $0x28] sm:$0xff]  ;;  %v1817_v20 = vld [vmem:[#allocation3 + $0x20] sm:$0xff] }
  0x3b   : > { %454 = vperm.xlu0 %1502, %v1103_v6   ;;  %1228 = vmatpush3.msra.mxu0 %v1748_v7  ;;  %v1821_v21 = vld [vmem:[#allocation3 + $0x18] sm:$0xff]  ;;  %v1825_v22 = vld [vmem:[#allocation3 + $0x10] sm:$0xff]  ;;  %v1829_v23 = vld [vmem:[#allocation3 + $0x8] sm:$0xff] }
  0x3c   : > { %1229 = vmatprep.subr.mxu0 %v1630_v4  ;;  %1259 = vmatpush3.msra.mxu1 %v1760_v9  ;;  %v1833_v24 = vld [vmem:[#allocation3] sm:$0xff]  ;;  %v278_v25 = vld [vmem:[#allocation2] sm:$0xff]  ;;  %v1106_v32 = vld [vmem:[%s1736_s17 + $0x10] sm:$0xff] }
  0x3d   : > { %1230 = vmatpush3.msra.mxu0 %v1755_v8  ;;  %1260 = vmatprep.subr.mxu1 %v1630_v4  ;;  %v1109_v33 = vld [vmem:[%s1736_s17 + $0x18] sm:$0xff] }
  0x3e   : > { %1231 = vmatprep.subr.mxu0 %v1630_v4  ;;  %1261 = vmatpush3.msra.mxu1 %v1768_v10 }
  0x3f   : > { %1232 = vmatpush3.msra.mxu0 %v1771_v11  ;;  %1262 = vmatprep.subr.mxu1 %v1630_v4 }
  0x40   : > { %1233 = vmatprep.subr.mxu0 %v1630_v4  ;;  %1263 = vmatpush3.msra.mxu1 %v1779_v12 }
  0x41   : > { %1234 = vmatpush3.msra.mxu0 %v1782_v13  ;;  %1264 = vmatprep.subr.mxu1 %v1630_v4 }
  0x42   : > { %1235 = vmatprep.subr.mxu0 %v1630_v4  ;;  %1265 = vmatpush3.msra.mxu1 %v1790_v14 }
  0x43   : > { %1236 = vmatpush3.msra.mxu0 %v1793_v15  ;;  %1269 = vmatprep.subr.mxu1 %v1630_v4 }
  0x44   : > { %1237 = vmatprep.subr.mxu0 %v1630_v4  ;;  %1503 = vset.pattern.permute.xlu1 %v1629_v3 }
  0x45   : > { %1238 = vmatpush3.msra.mxu0 %v1799_v16  ;;  %606 = vperm.xlu1 %1503, %v1106_v32  }
  0x46   : > { %1239 = vmatprep.subr.mxu0 %v1630_v4 }
  0x47   : > { %1240 = vmatpush3.msra.mxu0 %v1805_v17 }
  0x48   : > { %1241 = vmatprep.subr.mxu0 %v1630_v4 }
  0x49   : > { %1242 = vmatpush3.msra.mxu0 %v1809_v18  ;;  %758 = vperm.xlu1 %1503, %v1109_v33  }
  0x4a   : > { %1243 = vmatprep.subr.mxu0 %v1630_v4 }
  0x4b   : > { %1244 = vmatpush3.msra.mxu0 %v1813_v19 }
  0x4c   : > { %1245 = vmatprep.subr.mxu0 %v1630_v4 }
  0x4d   : > { %1246 = vmatpush3.msra.mxu0 %v1817_v20 }
  0x4e   : > { %1247 = vmatprep.subr.mxu0 %v1630_v4 }
  0x4f   : > { %1248 = vmatpush3.msra.mxu0 %v1821_v21 }
  0x50   : > { %1249 = vmatprep.subr.mxu0 %v1630_v4 }
  0x51   : > { %1250 = vmatpush3.msra.mxu0 %v1825_v22 }
  0x52   : > { %1251 = vmatprep.subr.mxu0 %v1630_v4 }
  0x53   : > { %1252 = vmatpush3.msra.mxu0 %v1829_v23 }
  0x54   : > { %1253 = vmatprep.subr.mxu0 %v1630_v4 }
  0x55   : > { %1254 = vmatpush3.msra.mxu0 %v1833_v24 }
  0x56   : > { %1304 = vmatprep.subr.mxu0 %v1630_v4  ;;  %1256 = vmatmul.mubr.f32.vlgmr.msra.gmra.mxu0 %v278_v25 }
  0x57   : > { %1305 = vmatpush3.msra.mxu0 %v1760_v9  ;;  %1312 = vmatprep.mubr.msk.f32.mxu0 %vm1631_vm0, %v1630_v4 }
  0x58   : > { %1306 = vmatprep.subr.mxu0 %v1630_v4 }
  0x59   : > { %1307 = vmatpush3.msra.mxu0 %v1768_v10 }
  0x5a   : > { %1308 = vmatprep.subr.mxu0 %v1630_v4 }
  0x5b   : > { %1309 = vmatpush3.msra.mxu0 %v1779_v12 }
  0x5c   : > { %1310 = vmatprep.subr.mxu0 %v1630_v4 }
  0x5d   : > { %1311 = vmatpush3.msra.mxu0 %v1790_v14 }
  0x5e   : > { %1315 = vmatprep.subr.mxu0 %v1630_v4 }
  0xb2   : > { %v282_v28 = vpop.permute.xlu0 %281 }
  0xb3   : > { %vm283_vm2 = vcmp.eq.s32.totalorder %v282_v28, %v1849_v27 }
  0xb4   : > { %v1101_v29 = vsel %vm283_vm2, 1.0, %v1630_v4 }
  0xb5   : > { %1267 = vmatmul.mubr.msk.f32.vlgmr.msra.gmra.mxu1 %vm376_vm1, %v1101_v29 }
  0xb6   : > { %v455_v30 = vpop.permute.xlu0 %454  ;;  %1270 = vmatpush3.msra.mxu1 %v1740_v2  ;;  %1301 = vmatprep.mubr.msk.f32.mxu1 %vm1631_vm0, %v1630_v4 }
  0xb7   : > { %vm456_vm3 = vcmp.eq.s32.totalorder %v455_v30, %v1849_v27  ;;  %1271 = vmatprep.subr.mxu1 %v1630_v4 }
  0xb8   : > { %v1104_v31 = vsel %vm456_vm3, 1.0, %v1630_v4  ;;  %1272 = vmatpush3.msra.mxu1 %v1743_v5 }
  0xb9   : > { %1313 = vmatmul.mubr.msk.f32.vlgmr.msra.gmra.mxu0 %vm376_vm1, %v1104_v31  ;;  %1273 = vmatprep.subr.mxu1 %v1630_v4 }
  0xba   : > { %1274 = vmatpush3.msra.mxu1 %v1748_v7  ;;  %1316 = vmatpush3.msra.mxu0 %v1740_v2 }
  0xbb   : > { %1275 = vmatprep.subr.mxu1 %v1630_v4  ;;  %1317 = vmatprep.subr.mxu0 %v1630_v4 }
  0xbc   : > { %1276 = vmatpush3.msra.mxu1 %v1755_v8  ;;  %1318 = vmatpush3.msra.mxu0 %v1743_v5 }
  0xbd   : > { %1277 = vmatprep.subr.mxu1 %v1630_v4  ;;  %1319 = vmatprep.subr.mxu0 %v1630_v4 }
  0xbe   : > { %1278 = vmatpush3.msra.mxu1 %v1771_v11  ;;  %1320 = vmatpush3.msra.mxu0 %v1748_v7 }
  0xbf   : > { %1279 = vmatprep.subr.mxu1 %v1630_v4  ;;  %1321 = vmatprep.subr.mxu0 %v1630_v4 }
  0xc0   : > { %1280 = vmatpush3.msra.mxu1 %v1782_v13  ;;  %1322 = vmatpush3.msra.mxu0 %v1755_v8  ;;  %v607_v42 = vpop.permute.xlu1 %606 }
  0xc1   : > { %1281 = vmatprep.subr.mxu1 %v1630_v4  ;;  %1323 = vmatprep.subr.mxu0 %v1630_v4  ;;  %vm608_vm4 = vcmp.eq.s32.totalorder %v607_v42, %v1849_v27 }
  0xc2   : > { %1282 = vmatpush3.msra.mxu1 %v1793_v15  ;;  %1324 = vmatpush3.msra.mxu0 %v1771_v11  ;;  %v1107_v43 = vsel %vm608_vm4, 1.0, %v1630_v4 }
  0xc3   : > { %1283 = vmatprep.subr.mxu1 %v1630_v4  ;;  %1325 = vmatprep.subr.mxu0 %v1630_v4 }
  0xc4   : > { %1284 = vmatpush3.msra.mxu1 %v1799_v16  ;;  %1326 = vmatpush3.msra.mxu0 %v1782_v13  ;;  %v759_v48 = vpop.permute.xlu1 %758 }
  0xc5   : > { %1285 = vmatprep.subr.mxu1 %v1630_v4  ;;  %1327 = vmatprep.subr.mxu0 %v1630_v4  ;;  %vm760_vm5 = vcmp.eq.s32.totalorder %v759_v48, %v1849_v27 }
  0xc6   : > { %1286 = vmatpush3.msra.mxu1 %v1805_v17  ;;  %1328 = vmatpush3.msra.mxu0 %v1793_v15  ;;  %v1110_v49 = vsel %vm760_vm5, 1.0, %v1630_v4 }
  0xc7   : > { %1287 = vmatprep.subr.mxu1 %v1630_v4  ;;  %1329 = vmatprep.subr.mxu0 %v1630_v4 }
  0xc8   : > { %1288 = vmatpush3.msra.mxu1 %v1809_v18  ;;  %1330 = vmatpush3.msra.mxu0 %v1799_v16 }
  0xc9   : > { %1289 = vmatprep.subr.mxu1 %v1630_v4  ;;  %1331 = vmatprep.subr.mxu0 %v1630_v4 }
  0xca   : > { %1290 = vmatpush3.msra.mxu1 %v1813_v19  ;;  %1332 = vmatpush3.msra.mxu0 %v1805_v17 }
  0xcb   : > { %1291 = vmatprep.subr.mxu1 %v1630_v4  ;;  %1333 = vmatprep.subr.mxu0 %v1630_v4 }
  0xcc   : > { %1292 = vmatpush3.msra.mxu1 %v1817_v20  ;;  %1334 = vmatpush3.msra.mxu0 %v1809_v18 }
  0xcd   : > { %1293 = vmatprep.subr.mxu1 %v1630_v4  ;;  %1335 = vmatprep.subr.mxu0 %v1630_v4 }
  0xce   : > { %1294 = vmatpush3.msra.mxu1 %v1821_v21  ;;  %1336 = vmatpush3.msra.mxu0 %v1813_v19 }
  0xcf   : > { %1295 = vmatprep.subr.mxu1 %v1630_v4  ;;  %1337 = vmatprep.subr.mxu0 %v1630_v4 }
  0xd0   : > { %1296 = vmatpush3.msra.mxu1 %v1825_v22  ;;  %1338 = vmatpush3.msra.mxu0 %v1817_v20 }
  0xd1   : > { %1297 = vmatprep.subr.mxu1 %v1630_v4  ;;  %1339 = vmatprep.subr.mxu0 %v1630_v4 }
  0xd2   : > { %1298 = vmatpush3.msra.mxu1 %v1829_v23  ;;  %1340 = vmatpush3.msra.mxu0 %v1821_v21 }
  0xd3   : > { %1299 = vmatprep.subr.mxu1 %v1630_v4  ;;  %1341 = vmatprep.subr.mxu0 %v1630_v4 }
  0xd4   : > { %1300 = vmatpush3.msra.mxu1 %v1833_v24  ;;  %1342 = vmatpush3.msra.mxu0 %v1825_v22 }
  0xd5   : > { %1350 = vmatprep.subr.mxu1 %v1630_v4  ;;  %1343 = vmatprep.subr.mxu0 %v1630_v4 }
  0xd6   : > { %1344 = vmatpush3.msra.mxu0 %v1829_v23  ;;  %1347 = vmatprep.mubr.msk.f32.mxu0 %vm1631_vm0, %v1630_v4 }
  0xd7   : > { %1345 = vmatprep.subr.mxu0 %v1630_v4 }
  0xd8   : > { %1346 = vmatpush3.msra.mxu0 %v1833_v24 }
  0xd9   : > { %1396 = vmatprep.subr.mxu0 %v1630_v4 }
 0x116   : > { %v372_v34 = vpop.f32.mrf.mxu0 }
 0x118   : > { %v1257_v35 = vpop.f32.mrf.mxu0 }
 0x175   : > { %v446_v36 = vpop.f32.mrf.mxu1 }
 0x176   : > { %v447_v37 = vadd.f32 %v446_v36, %v372_v34 }
 0x177   : > { %v1268_v38 = vpop.f32.mrf.mxu1 }
 0x178   : > { %1504 = vtanh.f32 %v447_v37 }
 0x179   : > { %v598_v39 = vpop.f32.mrf.mxu0 }
 0x17b   : > { %v1314_v40 = vpop.f32.mrf.mxu0 }
 0x185   : > { %v1505_v41 = vpop.eup %1504 }
 0x186   : > { %1302 = vmatmul.mubr.f32.vlgmr.msra.gmra.mxu1 %v1505_v41 }
 0x187   : > { %1351 = vmatpush3.msra.mxu1 %v1760_v9  ;;  %1358 = vmatprep.mubr.msk.f32.mxu1 %vm1631_vm0, %v1630_v4 }
 0x188   : > { %1352 = vmatprep.subr.mxu1 %v1630_v4 }
 0x189   : > { %1353 = vmatpush3.msra.mxu1 %v1768_v10 }
 0x18a   : > { %1354 = vmatprep.subr.mxu1 %v1630_v4 }
 0x18b   : > { %1355 = vmatpush3.msra.mxu1 %v1779_v12 }
 0x18c   : > { %1356 = vmatprep.subr.mxu1 %v1630_v4 }
 0x18d   : > { %1357 = vmatpush3.msra.mxu1 %v1790_v14 }
 0x18e   : > { %1361 = vmatprep.subr.mxu1 %v1630_v4  ;;  %1359 = vmatmul.mubr.msk.f32.vlgmr.msra.gmra.mxu1 %vm376_vm1, %v1107_v43 }
 0x18f   : > { %1362 = vmatpush3.msra.mxu1 %v1740_v2  ;;  %1393 = vmatprep.mubr.msk.f32.mxu1 %vm1631_vm0, %v1630_v4 }
 0x190   : > { %1363 = vmatprep.subr.mxu1 %v1630_v4 }
 0x191   : > { %1364 = vmatpush3.msra.mxu1 %v1743_v5 }
 0x192   : > { %1365 = vmatprep.subr.mxu1 %v1630_v4 }
 0x193   : > { %1366 = vmatpush3.msra.mxu1 %v1748_v7 }
 0x194   : > { %1367 = vmatprep.subr.mxu1 %v1630_v4 }
 0x195   : > { %1368 = vmatpush3.msra.mxu1 %v1755_v8 }
 0x196   : > { %1369 = vmatprep.subr.mxu1 %v1630_v4 }
 0x197   : > { %1370 = vmatpush3.msra.mxu1 %v1771_v11 }
 0x198   : > { %1371 = vmatprep.subr.mxu1 %v1630_v4 }
 0x199   : > { %1372 = vmatpush3.msra.mxu1 %v1782_v13 }
 0x19a   : > { %1373 = vmatprep.subr.mxu1 %v1630_v4 }
 0x19b   : > { %1374 = vmatpush3.msra.mxu1 %v1793_v15 }
 0x19c   : > { %1375 = vmatprep.subr.mxu1 %v1630_v4 }
 0x19d   : > { %1376 = vmatpush3.msra.mxu1 %v1799_v16 }
 0x19e   : > { %1377 = vmatprep.subr.mxu1 %v1630_v4 }
 0x19f   : > { %1378 = vmatpush3.msra.mxu1 %v1805_v17 }
 0x1a0   : > { %1379 = vmatprep.subr.mxu1 %v1630_v4 }
 0x1a1   : > { %1380 = vmatpush3.msra.mxu1 %v1809_v18 }
 0x1a2   : > { %1381 = vmatprep.subr.mxu1 %v1630_v4 }
 0x1a3   : > { %1382 = vmatpush3.msra.mxu1 %v1813_v19 }
 0x1a4   : > { %1383 = vmatprep.subr.mxu1 %v1630_v4 }
 0x1a5   : > { %1384 = vmatpush3.msra.mxu1 %v1817_v20 }
 0x1a6   : > { %1385 = vmatprep.subr.mxu1 %v1630_v4 }
 0x1a7   : > { %1386 = vmatpush3.msra.mxu1 %v1821_v21 }
 0x1a8   : > { %1387 = vmatprep.subr.mxu1 %v1630_v4 }
 0x1a9   : > { %1388 = vmatpush3.msra.mxu1 %v1825_v22 }
 0x1aa   : > { %1389 = vmatprep.subr.mxu1 %v1630_v4 }
 0x1ab   : > { %1390 = vmatpush3.msra.mxu1 %v1829_v23 }
 0x1ac   : > { %1391 = vmatprep.subr.mxu1 %v1630_v4 }
 0x1ad   : > { %1392 = vmatpush3.msra.mxu1 %v1833_v24 }
 0x246   : > { %v525_v44 = vpop.f32.mrf.mxu1 }
 0x247   : > { %v599_v45 = vadd.f32 %v598_v39, %v525_v44 }
 0x248   : > { %v1303_v46 = vpop.f32.mrf.mxu1 }
 0x249   : > { %1506 = vtanh.f32 %v599_v45 }
 0x24e   : > { %v750_v50 = vpop.f32.mrf.mxu1 }
 0x250   : > { %v1360_v51 = vpop.f32.mrf.mxu1 }
 0x256   : > { %v1507_v47 = vpop.eup %1506 }
 0x257   : > { %1348 = vmatmul.mubr.f32.vlgmr.msra.gmra.mxu0 %v1507_v47 }
 0x258   : > { %1397 = vmatpush3.msra.mxu0 %v1760_v9  ;;  %1404 = vmatprep.mubr.msk.f32.mxu0 %vm1631_vm0, %v1630_v4 }
 0x259   : > { %1398 = vmatprep.subr.mxu0 %v1630_v4 }
 0x25a   : > { %1399 = vmatpush3.msra.mxu0 %v1768_v10 }
 0x25b   : > { %1400 = vmatprep.subr.mxu0 %v1630_v4 }
 0x25c   : > { %1401 = vmatpush3.msra.mxu0 %v1779_v12 }
 0x25d   : > { %1402 = vmatprep.subr.mxu0 %v1630_v4 }
 0x25e   : > { %1403 = vmatpush3.msra.mxu0 %v1790_v14 }
 0x25f   : > { %1405 = vmatmul.mubr.msk.f32.vlgmr.msra.gmra.mxu0 %vm376_vm1, %v1110_v49 }
 0x317   : > { %v677_v52 = vpop.f32.mrf.mxu0 }
 0x318   : > { %v751_v53 = vadd.f32 %v750_v50, %v677_v52 }
 0x319   : > { %v1349_v54 = vpop.f32.mrf.mxu0 }
 0x31a   : > { %1508 = vtanh.f32 %v751_v53 }
 0x31f   : > { %v902_v55 = vpop.f32.mrf.mxu0 }
 0x321   : > { %v1406_v56 = vpop.f32.mrf.mxu0 }
 0x327   : > { %v1509_v57 = vpop.eup %1508 }
 0x328   : > { %1394 = vmatmul.mubr.f32.vlgmr.msra.gmra.mxu1 %v1509_v57 }
 0x3e8   : > { %v829_v58 = vpop.f32.mrf.mxu1 }
 0x3e9   : > { %v903_v59 = vadd.f32 %v902_v55, %v829_v58 }
 0x3ea   : > { %v1395_v60 = vpop.f32.mrf.mxu1 }
 0x3eb   : > { %1510 = vtanh.f32 %v903_v59 }
 0x3f5   : > { %911 = sbr.rel (%p1112_p4) target bundleno = 1247 (0x4df), region = 56 }
 0x3f8   : > { %v1511_v61 = vpop.eup %1510 }
 0x3f9   : > { %907 = vst [vmem:[#allocation2] sm:$0xff] %v1511_v61 }
 0x3fa   : > { %v927_v62 = vld [vmem:[#allocation6 + $0x78] sm:$0xff]  ;;  %v1632_v63 = vmov 0.0   ;;  %v926_v0 = vld [vmem:[#allocation6 + $0x70] sm:$0xff]  ;;  %vm1633_vm6 = vmmov 0   ;;  %v925_v1 = vld [vmem:[#allocation6 + $0x68] sm:$0xff] }
 0x3fb   : > { %1407 = vmatprep.subr.mxu0 %v1632_v63  ;;  %1439 = vmatprep.mubr.msk.f32.mxu0 %vm1633_vm6, %v1632_v63  ;;  %v924_v2 = vld [vmem:[#allocation6 + $0x60] sm:$0xff]  ;;  %v923_v3 = vld [vmem:[#allocation6 + $0x58] sm:$0xff]  ;;  %v922_v4 = vld [vmem:[#allocation6 + $0x50] sm:$0xff] }
 0x3fc   : > { %1408 = vmatpush3.msra.mxu0 %v927_v62  ;;  %v921_v5 = vld [vmem:[#allocation6 + $0x48] sm:$0xff]  ;;  %v920_v6 = vld [vmem:[#allocation6 + $0x40] sm:$0xff]  ;;  %v919_v7 = vld [vmem:[#allocation6 + $0x38] sm:$0xff] }
 0x3fd   : > { %1409 = vmatprep.subr.mxu0 %v1632_v63  ;;  %v918_v8 = vld [vmem:[#allocation6 + $0x30] sm:$0xff]  ;;  %v917_v9 = vld [vmem:[#allocation6 + $0x28] sm:$0xff]  ;;  %v916_v10 = vld [vmem:[#allocation6 + $0x20] sm:$0xff] }
 0x3fe   : > { %1410 = vmatpush3.msra.mxu0 %v926_v0  ;;  %v915_v11 = vld [vmem:[#allocation6 + $0x18] sm:$0xff]  ;;  %v914_v12 = vld [vmem:[#allocation6 + $0x10] sm:$0xff]  ;;  %v913_v13 = vld [vmem:[#allocation6 + $0x8] sm:$0xff] }
 0x3ff   : > { %1411 = vmatprep.subr.mxu0 %v1632_v63  ;;  %v912_v14 = vld [vmem:[#allocation6] sm:$0xff]  ;;  %v1113_v15 = vld [vmem:[%s2019_s4] ss:$0 sm:$0xff] }
 0x400   : > { %1412 = vmatpush3.msra.mxu0 %v925_v1 }
 0x401   : > { %1413 = vmatprep.subr.mxu0 %v1632_v63 }
 0x402   : > { %1414 = vmatpush3.msra.mxu0 %v924_v2 }
 0x403   : > { %1415 = vmatprep.subr.mxu0 %v1632_v63 }
 0x404   : > { %1416 = vmatpush3.msra.mxu0 %v923_v3 }
 0x405   : > { %1417 = vmatprep.subr.mxu0 %v1632_v63 }
 0x406   : > { %1418 = vmatpush3.msra.mxu0 %v922_v4 }
 0x407   : > { %1419 = vmatprep.subr.mxu0 %v1632_v63 }
 0x408   : > { %1420 = vmatpush3.msra.mxu0 %v921_v5 }
 0x409   : > { %1421 = vmatprep.subr.mxu0 %v1632_v63 }
 0x40a   : > { %1422 = vmatpush3.msra.mxu0 %v920_v6 }
 0x40b   : > { %1423 = vmatprep.subr.mxu0 %v1632_v63 }
 0x40c   : > { %1424 = vmatpush3.msra.mxu0 %v919_v7 }
 0x40d   : > { %1425 = vmatprep.subr.mxu0 %v1632_v63 }
 0x40e   : > { %1426 = vmatpush3.msra.mxu0 %v918_v8 }
 0x40f   : > { %1427 = vmatprep.subr.mxu0 %v1632_v63 }
 0x410   : > { %1428 = vmatpush3.msra.mxu0 %v917_v9 }
 0x411   : > { %1429 = vmatprep.subr.mxu0 %v1632_v63 }
 0x412   : > { %1430 = vmatpush3.msra.mxu0 %v916_v10 }
 0x413   : > { %1431 = vmatprep.subr.mxu0 %v1632_v63 }
 0x414   : > { %1432 = vmatpush3.msra.mxu0 %v915_v11 }
 0x415   : > { %1433 = vmatprep.subr.mxu0 %v1632_v63 }
 0x416   : > { %1434 = vmatpush3.msra.mxu0 %v914_v12 }
 0x417   : > { %1435 = vmatprep.subr.mxu0 %v1632_v63 }
 0x418   : > { %1436 = vmatpush3.msra.mxu0 %v913_v13 }
 0x419   : > { %1437 = vmatprep.subr.mxu0 %v1632_v63 }
 0x41a   : > { %1438 = vmatpush3.msra.mxu0 %v912_v14 }
 0x41b   : > { %1440 = vmatmul.mubr.f32.vlgmr.msra.gmra.mxu0 %v1511_v61 }
 0x4db   : > { %v1001_v16 = vpop.f32.mrf.mxu0 }
 0x4dc   : > { %v1002_v17 = vadd.f32 %v1113_v15, %v1001_v16 }
 0x4dd   : > { %v1441_v18 = vpop.f32.mrf.mxu0 }
 0x4de   : > { %1005 = vst [vmem:[#allocation8] sm:$0xff] %v1002_v17 }
 0x4df PF: > { %p1991_p6 = scmp.eq.s32.totalorder %s1090_s21, 1  ;;  %s1634_s8 = smov [#allocation8]  }
 0x4e0   : > { %s1015_s9 = sshll.u32 %s1634_s8, 4  ;;  %s1016_s9 = int_to_ptr.vmem [resolvable:$true] %s1015_s9 }
 0x4e1   : > { %s1564_s10 = scalar_lea.vmem %s1016_s9, 128  ;;  %p1571_p1 = scmp.lt.s32.totalorder %s1016_s9, %s1016_s9 }
 0x4e2   : > { %p1565_p12 = scmp.ne.s32.totalorder %s1016_s9, %s1564_s10  ;;  %p1572_p2 = scmp.lt.s32.totalorder %s1564_s10, %s1564_s10 }
 0x4e4   : > { %p1566_p13 = pnand %p1565_p12, %p1991_p6  ;;  %p1573_p5 = por %p1572_p2, %p1571_p1 }
 0x4e6   : > { %p1567_p0 = pneg %p1566_p13 }
 0x4e8   : > { %p1574_p8 = pnand %p1573_p5, %p1567_p0 }
 0x4ea   : > { %1577 = shalt.err (!%p1574_p8)
}
 0x4eb   : > { %1451 = dma.vmem_to_hbm [thread:$0]  (%p1991_p6), %s1016_s9, 128, %s2020_s5, [#allocation5]  }
 0x4ec   : > { %1609 = dma.done.wait (%p1991_p6), [#allocation5], 128  }
 0x4ed   : > { %1611 = vsyncadd (%p1991_p6), [#allocation5], 4294967168 }
 0x4ee PF: > { %s18_s20 = sadd.s32 1, %s1622_s20   ;;  %s2025_s18 = smov %s1618_s19 }
 0x4ef   : > { %p15_p9 = scmp.ge.s32.totalorder %s18_s20, 4   ;;  %s2026_s19 = smov %s2028_s22 }
 0x4f1   :  { %17 = sbr.rel (!%p15_p9) target bundleno = 4 (0x4), region = 88 }
 0x4f6   :  { %1028 = vsyncpa [#allocation4], 1 }
 0x4f7   :  { %1030 = vsyncpa [#allocation4 + $0x1], 1 }
 0x4f8   :  { %1031 = vsyncpa [#allocation7], 1 }
 0x4f9   :  { %1032 = vsyncpa [#allocation5], 1 }
 0x4fa   :  { %1034 = vsyncpa [#allocation5 + $0x1], 1 }

</bundles_post_ra>
